<compile_context>
chip_gen: v5e
topology: v5e:2x2
jax: 0.10.0
libtpu: 0.0.40
codegen_flags: <defaults>
</compile_context>

<pallas_src>
import jax
import jax.numpy as jnp
from jax.experimental import pallas as pl
from jax.experimental.pallas import tpu as pltpu


def _round_up(v, m):
    return (v + m - 1) // m * m


def _make_kernel(inv_hw):
    def kernel(x_ref, w_ref, b_ref, o_ref, acc_ref):
        """One (batch-tile, channel-tile) grid step.

        x_ref  : (TN, TC, HW)  input tile; HW lane-dense, C on sublanes.
        w_ref  : (TC, NCp)     weight tile (unscaled).
        b_ref  : (1, NCp)      bias, lane-padded to a multiple of 128.
        o_ref  : (TN, NCp)     output tile (resident across the C grid axis).
        acc_ref: (TN, NCp) f32 accumulator scratch.
        """
        ci = pl.program_id(1)

        @pl.when(ci == 0)
        def _():
            acc_ref[...] = jnp.zeros_like(acc_ref)

        # Global-avg-pool partial SUM over spatial (lane) axis, accumulated in f32.
        pooled = jnp.sum(x_ref[...], axis=-1, dtype=jnp.float32)          # (TN, TC)
        # Partial contraction over this channel tile on the MXU.
        acc_ref[...] += jnp.dot(pooled, w_ref[...].astype(jnp.float32),
                                preferred_element_type=jnp.float32)       # (TN, NCp)

        @pl.when(ci == pl.num_programs(1) - 1)
        def _():
            o_ref[...] = (acc_ref[...] * inv_hw
                          + b_ref[...].astype(jnp.float32)).astype(o_ref.dtype)

    return kernel


def _vmem_budgets():
    """Per-generation (x-buffer budget, vmem_limit_bytes)."""
    try:
        cap = pltpu.get_tpu_info().vmem_capacity_bytes
    except Exception:
        cap = 64 * 1024 * 1024
    if cap >= 100 * 1024 * 1024:          # v5e / v6e: 128 MiB physical VMEM
        return 20 * 1024 * 1024, 64 * 1024 * 1024
    # v7x (64 MiB per TensorCore) or unknown: stay well under the ceiling.
    return 10 * 1024 * 1024, 44 * 1024 * 1024


def _pick_tiles(n, c, hw, nc_pad, x_isz, w_isz, o_isz, x_buf_budget, vmem_budget):
    """Pick (TN, TC) dividing (N, C), lane/sublane legal, within VMEM budgets."""
    # Channel tile: multiple of 128 when possible (sublane/lane legal), else full C.
    if c % 128 == 0:
        tc = 128
        for cand in (512, 256):
            if c % cand == 0:
                tc = cand
                break
    else:
        tc = c
    # Batch tile: largest power-of-two divisor of N (it amortizes weight re-reads).
    if n % 8 == 0:
        tn = 8
        for cand in (512, 256, 128, 64, 32, 16):
            if n % cand == 0:
                tn = cand
                break
    else:
        tn = n  # full batch dim (allowed as a full-array-dim block)

    def fits(tn_, tc_):
        x_tile = tn_ * tc_ * hw * x_isz
        w_tile = tc_ * nc_pad * w_isz
        out_tile = tn_ * nc_pad * o_isz
        acc = tn_ * nc_pad * 4
        bias = nc_pad * 4
        total = 2 * x_tile + 2 * w_tile + 2 * out_tile + acc + 2 * bias
        return x_tile <= x_buf_budget and total <= vmem_budget

    # Shrink tc first (granularity only; total weight traffic unchanged),
    # then tn (each halving doubles total weight reads).
    while not fits(tn, tc) and tc % 256 == 0:
        tc //= 2
    while not fits(tn, tc) and tn % 16 == 0:
        tn //= 2
    return tn, tc


def classifier_head(x, weight, bias):
    """x: (N, C, H, W); weight: (num_classes, C); bias: (num_classes,) -> (N, num_classes)."""
    n, c, h, w = x.shape
    hw = h * w
    num_classes = weight.shape[0]
    nc_pad = _round_up(num_classes, 128)

    # Free, contiguous view — no transpose pass over x before the kernel reads it.
    # TODO(synk): for tiny HW (e.g. 7x7=49) this read is lane-sparse; benchmark
    # allow_input_fusion of an NHWC relayout in that regime.
    x_v = x.reshape(n, c, hw)

    # Keep weights UNSCALED (mean scale applied to the f32 accumulator in-kernel).
    w_pad = jnp.pad(weight.T, ((0, 0), (0, nc_pad - num_classes)))          # (C, NCp)
    b_pad = jnp.pad(bias, (0, nc_pad - num_classes)).reshape(1, nc_pad)     # (1, NCp)

    x_buf_budget, vmem_limit = _vmem_budgets()
    tn, tc = _pick_tiles(n, c, hw, nc_pad,
                         x_v.dtype.itemsize, w_pad.dtype.itemsize, x.dtype.itemsize,
                         x_buf_budget, vmem_limit)
    grid = (n // tn, c // tc)

    # HBM traffic: x once; weights re-streamed once per batch tile unless the
    # channel grid has a single step (then the unchanged block index dedups DMA).
    w_reads = grid[0] if grid[1] > 1 else 1
    cost = pl.CostEstimate(
        flops=n * c * hw + 2 * n * c * nc_pad,
        transcendentals=0,
        bytes_accessed=(x_v.size * x_v.dtype.itemsize
                        + w_reads * w_pad.size * w_pad.dtype.itemsize
                        + b_pad.size * b_pad.dtype.itemsize
                        + n * nc_pad * x.dtype.itemsize),
    )

    out_padded = pl.pallas_call(
        _make_kernel(1.0 / hw),
        out_shape=jax.ShapeDtypeStruct((n, nc_pad), x.dtype),
        grid_spec=pltpu.PrefetchScalarGridSpec(
            num_scalar_prefetch=0,
            grid=grid,
            in_specs=[
                pl.BlockSpec((tn, tc, hw), lambda i, j: (i, j, 0)),
                pl.BlockSpec((tc, nc_pad), lambda i, j: (j, 0)),
                pl.BlockSpec((1, nc_pad), lambda i, j: (0, 0)),
            ],
            out_specs=pl.BlockSpec((tn, nc_pad), lambda i, j: (i, 0)),
            scratch_shapes=[pltpu.VMEM((tn, nc_pad), jnp.float32)],
        ),
        compiler_params=pltpu.CompilerParams(
            dimension_semantics=("parallel", "arbitrary"),
            vmem_limit_bytes=vmem_limit,
        ),
        cost_estimate=cost,
    )(x_v, w_pad, b_pad)

    return out_padded[:, :num_classes]


def _reference(x, weight, bias):
    pooled = jnp.mean(x, axis=(2, 3))        # (N, C)
    return pooled @ weight.T + bias


if __name__ == "__main__":
    key = jax.random.PRNGKey(0)
    k_x, k_w, k_b = jax.random.split(key, 3)

    N, C, H, W = 2, 4, 16, 16
    NUM_CLASSES = 10

    x = jax.random.normal(k_x, (N, C, H, W), dtype=jnp.float32)
    bound = 1.0 / (C ** 0.5)
    weight = jax.random.uniform(k_w, (NUM_CLASSES, C), minval=-bound, maxval=bound,
                                dtype=jnp.float32)
    bias = jax.random.uniform(k_b, (NUM_CLASSES,), minval=-bound, maxval=bound,
                              dtype=jnp.float32)

    out = classifier_head(x, weight, bias)
    jax.block_until_ready(out)

    ref = _reference(x, weight, bias)
    assert out.shape == (N, NUM_CLASSES)
    assert jnp.allclose(out, ref, atol=1e-5, rtol=1e-5), "mismatch vs reference"

    print("KERNEL_OK")
</pallas_src>

<mosaic_0001>
module attributes {stable_mosaic.version = 11 : i64} {
  func.func @kernel(%arg0: i32, %arg1: i32, %arg2: memref<2x4x256xf32, #tpu.memory_space<vmem>>, %arg3: memref<4x128xf32, #tpu.memory_space<vmem>>, %arg4: memref<1x128xf32, #tpu.memory_space<vmem>>, %arg5: memref<2x128xf32, #tpu.memory_space<vmem>>, %arg6: memref<2x128xf32, #tpu.memory_space<vmem>>) attributes {dimension_semantics = [#tpu.dimension_semantics<parallel>, #tpu.dimension_semantics<arbitrary>], iteration_bounds = array<i64: 1, 1>, scalar_prefetch = 0 : i64, scratch_operands = 1 : i64, tpu.core_type = #tpu.core_type<tc>, window_params = [{transform_indices = @transform_0, window_bounds = array<i64: 2, 4, 256>}, {transform_indices = @transform_1, window_bounds = array<i64: 4, 128>}, {pipeline_mode = #tpu.pipeline_mode<synchronous>, transform_indices = @transform_2, window_bounds = array<i64: 1, 128>}, {transform_indices = @transform_3, window_bounds = array<i64: 2, 128>}]} {
    %c0_i32 = arith.constant 0 : i32
    %0 = arith.cmpi eq, %arg1, %c0_i32 : i32
    %1 = arith.extui %0 : i1 to i32
    %c0_i32_0 = arith.constant 0 : i32
    %2 = arith.cmpi ne, %1, %c0_i32_0 : i32
    scf.if %2 {
      %cst_12 = arith.constant 0.000000e+00 : f32
      %13 = vector.broadcast %cst_12 : f32 to vector<2x128xf32>
      %c0_13 = arith.constant 0 : index
      %c0_14 = arith.constant 0 : index
      %14 = vector.load %arg6[%c0_13, %c0_14] : memref<2x128xf32, #tpu.memory_space<vmem>>, vector<2x128xf32>
      tpu.vector_store %arg6[%c0_13, %c0_14], %13 {strides = array<i32>} : memref<2x128xf32, #tpu.memory_space<vmem>>, vector<2x128xf32>,
    } else {
    }
    %c0 = arith.constant 0 : index
    %c0_1 = arith.constant 0 : index
    %c0_2 = arith.constant 0 : index
    %3 = vector.load %arg2[%c0, %c0_1, %c0_2] : memref<2x4x256xf32, #tpu.memory_space<vmem>>, vector<2x4x256xf32>
    %cst = arith.constant dense<0.000000e+00> : vector<2x4xf32>
    %4 = vector.multi_reduction <add>, %3, %cst [2] : vector<2x4x256xf32> to vector<2x4xf32>
    %c0_3 = arith.constant 0 : index
    %c0_4 = arith.constant 0 : index
    %5 = vector.load %arg6[%c0_3, %c0_4] : memref<2x128xf32, #tpu.memory_space<vmem>>, vector<2x128xf32>
    %c0_5 = arith.constant 0 : index
    %c0_6 = arith.constant 0 : index
    %6 = vector.load %arg3[%c0_5, %c0_6] : memref<4x128xf32, #tpu.memory_space<vmem>>, vector<4x128xf32>
    %cst_7 = arith.constant dense<0.000000e+00> : vector<2x128xf32>
    %7 = tpu.matmul %4, %6, %cst_7 {dimension_numbers = #tpu.dot_dimension_numbers<[1], [0], [0], [1], [0, 0, 1, 1], [], []>} : vector<2x4xf32>, vector<4x128xf32>, vector<2x128xf32> -> vector<2x128xf32>
    %8 = arith.addf %5, %7 : vector<2x128xf32>
    %c0_8 = arith.constant 0 : index
    %c0_9 = arith.constant 0 : index
    %9 = vector.load %arg6[%c0_8, %c0_9] : memref<2x128xf32, #tpu.memory_space<vmem>>, vector<2x128xf32>
    tpu.vector_store %arg6[%c0_8, %c0_9], %8 {strides = array<i32>} : memref<2x128xf32, #tpu.memory_space<vmem>>, vector<2x128xf32>,
    %c0_i32_10 = arith.constant 0 : i32
    %10 = arith.cmpi eq, %arg1, %c0_i32_10 : i32
    %11 = arith.extui %10 : i1 to i32
    %c0_i32_11 = arith.constant 0 : i32
    %12 = arith.cmpi ne, %11, %c0_i32_11 : i32
    scf.if %12 {
      %c0_12 = arith.constant 0 : index
      %c0_13 = arith.constant 0 : index
      %13 = vector.load %arg6[%c0_12, %c0_13] : memref<2x128xf32, #tpu.memory_space<vmem>>, vector<2x128xf32>
      %cst_14 = arith.constant 3.906250e-03 : f32
      %14 = vector.broadcast %cst_14 : f32 to vector<2x128xf32>
      %15 = arith.mulf %13, %14 : vector<2x128xf32>
      %c0_15 = arith.constant 0 : index
      %c0_16 = arith.constant 0 : index
      %16 = vector.load %arg4[%c0_15, %c0_16] : memref<1x128xf32, #tpu.memory_space<vmem>>, vector<1x128xf32>
      %17 = vector.broadcast %16 : vector<1x128xf32> to vector<2x128xf32>
      %18 = arith.addf %15, %17 : vector<2x128xf32>
      %c0_17 = arith.constant 0 : index
      %c0_18 = arith.constant 0 : index
      %19 = vector.load %arg5[%c0_17, %c0_18] : memref<2x128xf32, #tpu.memory_space<vmem>>, vector<2x128xf32>
      tpu.vector_store %arg5[%c0_17, %c0_18], %18 {strides = array<i32>} : memref<2x128xf32, #tpu.memory_space<vmem>>, vector<2x128xf32>,
    } else {
    }
    return
  }
  func.func @transform_0(%arg0: i32, %arg1: i32) -> (i32, i32, i32) {
    %c0_i32 = arith.constant 0 : i32
    %c0_i32_0 = arith.constant 0 : i32
    return %arg0, %arg1, %c0_i32 : i32, i32, i32
  }
  func.func @transform_1(%arg0: i32, %arg1: i32) -> (i32, i32) {
    %c0_i32 = arith.constant 0 : i32
    %c0_i32_0 = arith.constant 0 : i32
    return %arg1, %c0_i32 : i32, i32
  }
  func.func @transform_2(%arg0: i32, %arg1: i32) -> (i32, i32) {
    %c0_i32 = arith.constant 0 : i32
    %c0_i32_0 = arith.constant 0 : i32
    %c0_i32_1 = arith.constant 0 : i32
    return %c0_i32, %c0_i32_0 : i32, i32
  }
  func.func @transform_3(%arg0: i32, %arg1: i32) -> (i32, i32) {
    %c0_i32 = arith.constant 0 : i32
    %c0_i32_0 = arith.constant 0 : i32
    return %arg0, %c0_i32 : i32, i32
  }
}

</mosaic_0001>

<bundles_post_ra>
// kernel: tpu_custom_call.1
= control target key start
LH: loop header
LB: loop body
LE: loop exit
PB: predicated region body
PF: predicated region fallthrough
CT: control target
= control target key end

     0   :  { %8 = vsyncpa [#allocation4], 0  ;;  %s268_s0 = inlined_call_operand.hbm [shape: f32[2,4,256], index: 0, kind: input, shape index: {}]   ;;  %s269_s1 = inlined_call_operand.hbm [shape: f32[4,128], index: 1, kind: input, shape index: {}]   ;;  %s270_s2 = inlined_call_operand.vmem [shape: f32[1,128], index: 2, kind: input, shape index: {}]   ;;  %s271_s3 = inlined_call_operand.hbm [shape: f32[2,128], index: 3, kind: output, shape index: {}]  }
   0x1   :  { %9 = vsyncpa [#allocation7], 0 }
   0x2   :  { %10 = vsyncpa [#allocation5], 0  ;;  %s15_s14 = sshll.u32 %s268_s0, 4  ;;  %s230_s15 = smov [#allocation3]   ;;  %s16_s14 = int_to_ptr.hbm [resolvable:$true] %s15_s14 }
   0x3   :  { %s17_s16 = sshll.u32 %s230_s15, 4  ;;  %s29_s19 = sshll.u32 %s269_s1, 4  ;;  %s18_s16 = int_to_ptr.vmem [resolvable:$true] %s17_s16  ;;  %s30_s19 = int_to_ptr.hbm [resolvable:$true] %s29_s19 }
   0x4   :  { %s231_s20 = smov 128   ;;  %s232_s21 = smov 8  }
   0x5   :  { %23 = dma.hbm_to_vmem [thread:$0]  %s16_s14, 256, %s18_s16, [#allocation4], %s231_s20, %s231_s20, %s232_s21  }
   0x6   :  { %s233_s22 = smov [#allocation6]  }
   0x7   :  { %s31_s23 = sshll.u32 %s233_s22, 4  ;;  %s32_s23 = int_to_ptr.vmem [resolvable:$true] %s31_s23 }
   0x8   :  { %34 = dma.hbm_to_vmem [thread:$0]  %s30_s19, 64, %s32_s23, [#allocation7]  }
   0x9   :  { %224 = dma.done.wait [#allocation4], 256  }
   0xa   :  { %225 = vsyncadd [#allocation4], 4294967040 }
   0xb   :  { %226 = dma.done.wait [#allocation7], 64  }
   0xc   :  { %227 = vsyncadd [#allocation7], 4294967232  ;;  %v50_v0 = vld [vmem:[#allocation3] sm:$0xff]  ;;  %v51_v1 = vld [vmem:[#allocation3 + $0x8] sm:$0xff]  ;;  %vm65_vm0 = vcmask 1043456   ;;  %v234_v13 = vmov 0.0   ;;  %v80_v15 = vlaneseq }
   0xd   :  { %54 = vst [vmem:[#allocation1] ss:$2 sm:$0xff] %v50_v0  ;;  %v77_v12 = vld [vmem:[#allocation6] sm:$0xf]  ;;  %vm84_vm1 = vcmask 1041409   ;;  %vm86_vm2 = vcmask 31744  }
   0xe   :  { %58 = vst [vmem:[#allocation1 + $0x10] ss:$2 sm:$0xff] %v51_v1  ;;  %143 = vmatpush.msk.msra.mxu0 %vm65_vm0, %v77_v12  ;;  %v81_v16 = vand.u32 127, %v80_v15  ;;  %v151_v24 = vld [vmem:[%s270_s2] ss:$0 sm:$0xff]  ;;  %s235_s24 = smov [#allocation8]  }
   0xf   :  { %49 = vst [vmem:[#allocation2] sm:$0x3] %v234_v13  ;;  %s130_s25 = sshll.u32 %s235_s24, 4  ;;  %s132_s28 = sshll.u32 %s271_s3, 4  ;;  %s131_s25 = int_to_ptr.vmem [resolvable:$true] %s130_s25  ;;  %s133_s28 = int_to_ptr.hbm [resolvable:$true] %s132_s28 }
  0x14   :  { %v55_v2 = vld.sshfl [vmem:[#allocation1] sm:$0xff pattern:$0x75316420]  ;;  %v56_v3 = vld.sshfl [vmem:[#allocation1 + $0x8] sm:$0xff pattern:$0x75316420] }
  0x15   :  { %v66_v4 = vsel %vm65_vm0, %v55_v2, 0.0  ;;  %v67_v5 = vsel %vm65_vm0, %v56_v3, 0.0  ;;  %v59_v7 = vld.sshfl [vmem:[#allocation1 + $0x10] sm:$0xff pattern:$0x75316420] }
  0x16   :  { %v68_v6 = vadd.f32 %v67_v5, %v66_v4  ;;  %v60_v8 = vld.sshfl [vmem:[#allocation1 + $0x18] sm:$0xff pattern:$0x75316420]  ;;  %v71_v9 = vsel %vm65_vm0, %v59_v7, 0.0  ;;  %v76_v21 = vld [vmem:[#allocation2] sm:$0x3] }
  0x17   :  { %v72_v10 = vsel %vm65_vm0, %v60_v8, 0.0 }
  0x18   :  { %69 = vadd.xlane.f32.xlu0 %v68_v6  ;;  %v73_v11 = vadd.f32 %v72_v10, %v71_v9 }
  0x20   :  { %74 = vadd.xlane.f32.xlu0 %v73_v11 }
  0x8b   :  { %v70_v14 = vpop.xlane.xlu0 %69 }
  0x8c   :  { %v82_v18 = vperm.slane %v70_v14, %v81_v16 }
  0x93   :  { %v75_v17 = vpop.xlane.xlu0 %74 }
  0x94   :  { %v83_v19 = vperm.slane %v75_v17, %v81_v16 }
  0x96   :  { %v85_v20 = vsel %vm84_vm1, %v83_v19, %v82_v18 }
  0x97   :  { %144 = vmatmul.msk.f32.vlgmr.msra.gmra.mxu0 %vm86_vm2, %v85_v20 }
 0x114   :  { %v109_v22 = vpop.f32.mrf.mxu0 }
 0x115   :  { %v112_v23 = vadd.f32 %v109_v22, %v76_v21 }
 0x117   :  { %113 = vst [vmem:[#allocation2] sm:$0x3] %v112_v23 }
 0x11e   :  { %v117_v25 = vld [vmem:[#allocation2] sm:$0x3] }
 0x11f   :  { %v118_v26 = vmul.f32 0.00390625, %v117_v25 }
 0x121   :  { %v123_v27 = vadd.f32 %v151_v24, %v118_v26 }
 0x123   :  { %124 = vst [vmem:[#allocation8] sm:$0x3] %v123_v27 }
 0x124   :  { %135 = dma.vmem_to_hbm [thread:$0]  %s131_s25, 32, %s133_s28, [#allocation5]  }
 0x125   :  { %228 = dma.done.wait [#allocation5], 32  }
 0x126   :  { %229 = vsyncadd [#allocation5], 4294967264 }
 0x127   :  { %140 = vsyncpa [#allocation4], 1 }
 0x128   :  { %141 = vsyncpa [#allocation7], 1 }
 0x129   :  { %142 = vsyncpa [#allocation5], 1 }

</bundles_post_ra>
